<compile_context>
chip_gen: v5e
topology: v5e:2x2
jax: 0.10.0
libtpu: 0.0.40
codegen_flags: <defaults>
</compile_context>

<pallas_src>
import jax
import jax.numpy as jnp
from jax.experimental import pallas as pl
from jax.experimental.pallas import tpu as pltpu


LATENT = 16
HID1, HID2 = 256, 64


def _leaky_relu(x, negative_slope=0.2):
    return jnp.where(x > 0, x, negative_slope * x)


def _round_up(n, m):
    return ((n + m - 1) // m) * m


def _default_tile_b(B):
    """Batch tile: large (amortize ~0.35us/grid-step), 256-aligned for clean MXU
    M passes, and at most ~ceil(B/2) so the 'parallel' grid has >= 2 steps for
    v7x's two TensorCores.  For small B a single full-extent block is used
    (block dim == array dim is always a legal BlockSpec)."""
    if B <= 512:
        return B
    cap = _round_up(pl.cdiv(B, 2), 256)
    return min(1024, cap)


def autoencoder_kernel(
    x_ref,
    w1_ref, b1_ref, w2_ref, b2_ref, w3_ref, b3_ref,      # encoder
    w4_ref, b4_ref, w5_ref, b5_ref, w6_ref, b6_ref,      # decoder
    enc_ref, dec_ref,
):
    def dense(a, w_ref, b_ref):
        # Cast the activation to the weight dtype (no-op for f32, bf16 MXU rate
        # for the bf16 path) and accumulate in f32.
        return (
            jnp.dot(a.astype(w_ref.dtype), w_ref[...],
                    preferred_element_type=jnp.float32)
            + b_ref[...].astype(jnp.float32)
        )

    x = x_ref[...]

    # ---- encoder: Linear(in,256) -> LReLU -> Linear(256,64) -> LReLU -> Linear(64,16)
    h = _leaky_relu(dense(x, w1_ref, b1_ref))
    h = _leaky_relu(dense(h, w2_ref, b2_ref))
    enc = dense(h, w3_ref, b3_ref)                        # (TILE_B, 16), f32
    enc_ref[...] = enc.astype(enc_ref.dtype)              # true 16-lane writeback

    # ---- decoder: Linear(16,64) -> LReLU -> Linear(64,256) -> LReLU -> Linear(256,in)
    d = _leaky_relu(dense(enc, w4_ref, b4_ref))
    d = _leaky_relu(dense(d, w5_ref, b5_ref))
    dec = dense(d, w6_ref, b6_ref)
    dec_ref[...] = dec.astype(dec_ref.dtype)


def make_params(input_dim, key, dtype=jnp.float32):
    """Deterministic parameter init (uniform, PyTorch Linear fan-in scaling).
    Weights are stored [in_features, out_features]."""
    dims = [(input_dim, HID1), (HID1, HID2), (HID2, LATENT),   # encoder
            (LATENT, HID2), (HID2, HID1), (HID1, input_dim)]   # decoder
    params = []
    for (fan_in, fan_out) in dims:
        key, kw, kb = jax.random.split(key, 3)
        bound = 1.0 / (fan_in ** 0.5)
        w = jax.random.uniform(kw, (fan_in, fan_out), dtype, -bound, bound)
        b = jax.random.uniform(kb, (1, fan_out), dtype, -bound, bound)
        params += [w, b]
    return params


def autoencoder_forward(x, params, *, tile_b=None, compute_dtype=None):
    """Returns (encode, decode) like the PyTorch module.

    compute_dtype=jnp.bfloat16 enables the bf16-I/O / f32-accumulate fast path
    (outputs come back in bf16)."""
    if compute_dtype is not None:
        x = x.astype(compute_dtype)
        params = [p.astype(compute_dtype) for p in params]
    params = tuple(params)

    B, input_dim = x.shape
    out_dtype = x.dtype

    TILE_B = int(tile_b) if tile_b is not None else _default_tile_b(B)
    grid = (pl.cdiv(B, TILE_B),)

    # Weights/biases: full-array blocks, always block (0, 0) -> VMEM-resident
    # across every grid step; only the x/enc/dec tiles stream through the
    # double-buffered pipeline.
    param_specs = [pl.BlockSpec(p.shape, lambda i: (0, 0)) for p in params]

    enc, dec = pl.pallas_call(
        autoencoder_kernel,
        out_shape=(
            jax.ShapeDtypeStruct((B, LATENT), out_dtype),
            jax.ShapeDtypeStruct((B, input_dim), out_dtype),
        ),
        grid=grid,
        in_specs=[pl.BlockSpec((TILE_B, input_dim), lambda i: (i, 0))] + param_specs,
        out_specs=(
            pl.BlockSpec((TILE_B, LATENT), lambda i: (i, 0)),
            pl.BlockSpec((TILE_B, input_dim), lambda i: (i, 0)),
        ),
        compiler_params=pltpu.CompilerParams(
            dimension_semantics=("parallel",),
        ),
    )(x, *params)

    return enc, dec


def autoencoder_forward_ref(x, params):
    """Pure-JAX reference for correctness checking."""
    w1, b1, w2, b2, w3, b3, w4, b4, w5, b5, w6, b6 = params
    h = _leaky_relu(x @ w1 + b1)
    h = _leaky_relu(h @ w2 + b2)
    enc = h @ w3 + b3
    d = _leaky_relu(enc @ w4 + b4)
    d = _leaky_relu(d @ w5 + b5)
    dec = d @ w6 + b6
    return enc, dec


if __name__ == "__main__":
    key = jax.random.PRNGKey(0)
    key, kx, kp, kx2 = jax.random.split(key, 4)

    B, INPUT_DIM = 8, 32
    x = jax.random.normal(kx, (B, INPUT_DIM), jnp.float32)
    params = make_params(INPUT_DIM, kp)

    # Small demo batch (single grid step, block == full batch extent).
    enc, dec = autoencoder_forward(x, params)
    jax.block_until_ready((enc, dec))
    enc_ref, dec_ref = autoencoder_forward_ref(x, params)
    assert enc.shape == (B, LATENT) and dec.shape == (B, INPUT_DIM)
    assert jnp.allclose(enc, enc_ref, atol=1e-5, rtol=1e-5)
    assert jnp.allclose(dec, dec_ref, atol=1e-5, rtol=1e-5)

    # Multi-step grid with a ragged last block (B not a multiple of tile_b);
    # no wrapper padding, Pallas masks the edge block.
    B2 = 300
    x2 = jax.random.normal(kx2, (B2, INPUT_DIM), jnp.float32)
    enc2, dec2 = autoencoder_forward(x2, params, tile_b=128)
    jax.block_until_ready((enc2, dec2))
    enc2_ref, dec2_ref = autoencoder_forward_ref(x2, params)
    assert enc2.shape == (B2, LATENT) and dec2.shape == (B2, INPUT_DIM)
    assert jnp.allclose(enc2, enc2_ref, atol=1e-5, rtol=1e-5)
    assert jnp.allclose(dec2, dec2_ref, atol=1e-5, rtol=1e-5)

    # bf16 I/O + f32 accumulation fast path (v6e/v7x); relaxed tolerances.
    enc3, dec3 = autoencoder_forward(x2, params, compute_dtype=jnp.bfloat16)
    jax.block_until_ready((enc3, dec3))
    assert enc3.dtype == jnp.bfloat16 and dec3.dtype == jnp.bfloat16
    assert jnp.allclose(enc3.astype(jnp.float32), enc2_ref, atol=1e-1, rtol=1e-1)
    assert jnp.allclose(dec3.astype(jnp.float32), dec2_ref, atol=1e-1, rtol=1e-1)

    print("KERNEL_OK")
</pallas_src>

<mosaic_0001>
module attributes {stable_mosaic.version = 11 : i64} {
  func.func @autoencoder_kernel(%arg0: i32, %arg1: memref<8x32xf32, #tpu.memory_space<vmem>>, %arg2: memref<32x256xf32, #tpu.memory_space<vmem>>, %arg3: memref<1x256xf32, #tpu.memory_space<vmem>>, %arg4: memref<256x64xf32, #tpu.memory_space<vmem>>, %arg5: memref<1x64xf32, #tpu.memory_space<vmem>>, %arg6: memref<64x16xf32, #tpu.memory_space<vmem>>, %arg7: memref<1x16xf32, #tpu.memory_space<vmem>>, %arg8: memref<16x64xf32, #tpu.memory_space<vmem>>, %arg9: memref<1x64xf32, #tpu.memory_space<vmem>>, %arg10: memref<64x256xf32, #tpu.memory_space<vmem>>, %arg11: memref<1x256xf32, #tpu.memory_space<vmem>>, %arg12: memref<256x32xf32, #tpu.memory_space<vmem>>, %arg13: memref<1x32xf32, #tpu.memory_space<vmem>>, %arg14: memref<8x16xf32, #tpu.memory_space<vmem>>, %arg15: memref<8x32xf32, #tpu.memory_space<vmem>>) attributes {dimension_semantics = [#tpu.dimension_semantics<parallel>], iteration_bounds = array<i64: 1>, scalar_prefetch = 0 : i64, scratch_operands = 0 : i64, tpu.core_type = #tpu.core_type<tc>, window_params = [{transform_indices = @transform_0, window_bounds = array<i64: 8, 32>}, {pipeline_mode = #tpu.pipeline_mode<synchronous>, transform_indices = @transform_1, window_bounds = array<i64: 32, 256>}, {pipeline_mode = #tpu.pipeline_mode<synchronous>, transform_indices = @transform_2, window_bounds = array<i64: 1, 256>}, {pipeline_mode = #tpu.pipeline_mode<synchronous>, transform_indices = @transform_3, window_bounds = array<i64: 256, 64>}, {pipeline_mode = #tpu.pipeline_mode<synchronous>, transform_indices = @transform_4, window_bounds = array<i64: 1, 64>}, {pipeline_mode = #tpu.pipeline_mode<synchronous>, transform_indices = @transform_5, window_bounds = array<i64: 64, 16>}, {pipeline_mode = #tpu.pipeline_mode<synchronous>, transform_indices = @transform_6, window_bounds = array<i64: 1, 16>}, {pipeline_mode = #tpu.pipeline_mode<synchronous>, transform_indices = @transform_7, window_bounds = array<i64: 16, 64>}, {pipeline_mode = #tpu.pipeline_mode<synchronous>, transform_indices = @transform_8, window_bounds = array<i64: 1, 64>}, {pipeline_mode = #tpu.pipeline_mode<synchronous>, transform_indices = @transform_9, window_bounds = array<i64: 64, 256>}, {pipeline_mode = #tpu.pipeline_mode<synchronous>, transform_indices = @transform_10, window_bounds = array<i64: 1, 256>}, {pipeline_mode = #tpu.pipeline_mode<synchronous>, transform_indices = @transform_11, window_bounds = array<i64: 256, 32>}, {pipeline_mode = #tpu.pipeline_mode<synchronous>, transform_indices = @transform_12, window_bounds = array<i64: 1, 32>}, {transform_indices = @transform_13, window_bounds = array<i64: 8, 16>}, {transform_indices = @transform_14, window_bounds = array<i64: 8, 32>}]} {
    %c0 = arith.constant 0 : index
    %c0_0 = arith.constant 0 : index
    %0 = vector.load %arg1[%c0, %c0_0] : memref<8x32xf32, #tpu.memory_space<vmem>>, vector<8x32xf32>
    %c0_1 = arith.constant 0 : index
    %c0_2 = arith.constant 0 : index
    %1 = vector.load %arg2[%c0_1, %c0_2] : memref<32x256xf32, #tpu.memory_space<vmem>>, vector<32x256xf32>
    %cst = arith.constant dense<0.000000e+00> : vector<8x256xf32>
    %2 = tpu.matmul %0, %1, %cst {dimension_numbers = #tpu.dot_dimension_numbers<[1], [0], [0], [1], [0, 0, 1, 1], [], []>} : vector<8x32xf32>, vector<32x256xf32>, vector<8x256xf32> -> vector<8x256xf32>
    %c0_3 = arith.constant 0 : index
    %c0_4 = arith.constant 0 : index
    %3 = vector.load %arg3[%c0_3, %c0_4] : memref<1x256xf32, #tpu.memory_space<vmem>>, vector<1x256xf32>
    %4 = vector.broadcast %3 : vector<1x256xf32> to vector<8x256xf32>
    %5 = arith.addf %2, %4 : vector<8x256xf32>
    %cst_5 = arith.constant 0.000000e+00 : f32
    %6 = vector.broadcast %cst_5 : f32 to vector<8x256xf32>
    %7 = arith.cmpf ogt, %5, %6 : vector<8x256xf32>
    %cst_6 = arith.constant 2.000000e-01 : f32
    %8 = vector.broadcast %cst_6 : f32 to vector<8x256xf32>
    %9 = arith.mulf %8, %5 : vector<8x256xf32>
    %10 = arith.select %7, %5, %9 : vector<8x256xi1>, vector<8x256xf32>
    %c0_7 = arith.constant 0 : index
    %c0_8 = arith.constant 0 : index
    %11 = vector.load %arg4[%c0_7, %c0_8] : memref<256x64xf32, #tpu.memory_space<vmem>>, vector<256x64xf32>
    %cst_9 = arith.constant dense<0.000000e+00> : vector<8x64xf32>
    %12 = tpu.matmul %10, %11, %cst_9 {dimension_numbers = #tpu.dot_dimension_numbers<[1], [0], [0], [1], [0, 0, 1, 1], [], []>} : vector<8x256xf32>, vector<256x64xf32>, vector<8x64xf32> -> vector<8x64xf32>
    %c0_10 = arith.constant 0 : index
    %c0_11 = arith.constant 0 : index
    %13 = vector.load %arg5[%c0_10, %c0_11] : memref<1x64xf32, #tpu.memory_space<vmem>>, vector<1x64xf32>
    %14 = vector.broadcast %13 : vector<1x64xf32> to vector<8x64xf32>
    %15 = arith.addf %12, %14 : vector<8x64xf32>
    %cst_12 = arith.constant 0.000000e+00 : f32
    %16 = vector.broadcast %cst_12 : f32 to vector<8x64xf32>
    %17 = arith.cmpf ogt, %15, %16 : vector<8x64xf32>
    %cst_13 = arith.constant 2.000000e-01 : f32
    %18 = vector.broadcast %cst_13 : f32 to vector<8x64xf32>
    %19 = arith.mulf %18, %15 : vector<8x64xf32>
    %20 = arith.select %17, %15, %19 : vector<8x64xi1>, vector<8x64xf32>
    %c0_14 = arith.constant 0 : index
    %c0_15 = arith.constant 0 : index
    %21 = vector.load %arg6[%c0_14, %c0_15] : memref<64x16xf32, #tpu.memory_space<vmem>>, vector<64x16xf32>
    %cst_16 = arith.constant dense<0.000000e+00> : vector<8x16xf32>
    %22 = tpu.matmul %20, %21, %cst_16 {dimension_numbers = #tpu.dot_dimension_numbers<[1], [0], [0], [1], [0, 0, 1, 1], [], []>} : vector<8x64xf32>, vector<64x16xf32>, vector<8x16xf32> -> vector<8x16xf32>
    %c0_17 = arith.constant 0 : index
    %c0_18 = arith.constant 0 : index
    %23 = vector.load %arg7[%c0_17, %c0_18] : memref<1x16xf32, #tpu.memory_space<vmem>>, vector<1x16xf32>
    %24 = vector.broadcast %23 : vector<1x16xf32> to vector<8x16xf32>
    %25 = arith.addf %22, %24 : vector<8x16xf32>
    %c0_19 = arith.constant 0 : index
    %c0_20 = arith.constant 0 : index
    %26 = vector.load %arg14[%c0_19, %c0_20] : memref<8x16xf32, #tpu.memory_space<vmem>>, vector<8x16xf32>
    tpu.vector_store %arg14[%c0_19, %c0_20], %25 {strides = array<i32>} : memref<8x16xf32, #tpu.memory_space<vmem>>, vector<8x16xf32>,
    %c0_21 = arith.constant 0 : index
    %c0_22 = arith.constant 0 : index
    %27 = vector.load %arg8[%c0_21, %c0_22] : memref<16x64xf32, #tpu.memory_space<vmem>>, vector<16x64xf32>
    %cst_23 = arith.constant dense<0.000000e+00> : vector<8x64xf32>
    %28 = tpu.matmul %25, %27, %cst_23 {dimension_numbers = #tpu.dot_dimension_numbers<[1], [0], [0], [1], [0, 0, 1, 1], [], []>} : vector<8x16xf32>, vector<16x64xf32>, vector<8x64xf32> -> vector<8x64xf32>
    %c0_24 = arith.constant 0 : index
    %c0_25 = arith.constant 0 : index
    %29 = vector.load %arg9[%c0_24, %c0_25] : memref<1x64xf32, #tpu.memory_space<vmem>>, vector<1x64xf32>
    %30 = vector.broadcast %29 : vector<1x64xf32> to vector<8x64xf32>
    %31 = arith.addf %28, %30 : vector<8x64xf32>
    %cst_26 = arith.constant 0.000000e+00 : f32
    %32 = vector.broadcast %cst_26 : f32 to vector<8x64xf32>
    %33 = arith.cmpf ogt, %31, %32 : vector<8x64xf32>
    %cst_27 = arith.constant 2.000000e-01 : f32
    %34 = vector.broadcast %cst_27 : f32 to vector<8x64xf32>
    %35 = arith.mulf %34, %31 : vector<8x64xf32>
    %36 = arith.select %33, %31, %35 : vector<8x64xi1>, vector<8x64xf32>
    %c0_28 = arith.constant 0 : index
    %c0_29 = arith.constant 0 : index
    %37 = vector.load %arg10[%c0_28, %c0_29] : memref<64x256xf32, #tpu.memory_space<vmem>>, vector<64x256xf32>
    %cst_30 = arith.constant dense<0.000000e+00> : vector<8x256xf32>
    %38 = tpu.matmul %36, %37, %cst_30 {dimension_numbers = #tpu.dot_dimension_numbers<[1], [0], [0], [1], [0, 0, 1, 1], [], []>} : vector<8x64xf32>, vector<64x256xf32>, vector<8x256xf32> -> vector<8x256xf32>
    %c0_31 = arith.constant 0 : index
    %c0_32 = arith.constant 0 : index
    %39 = vector.load %arg11[%c0_31, %c0_32] : memref<1x256xf32, #tpu.memory_space<vmem>>, vector<1x256xf32>
    %40 = vector.broadcast %39 : vector<1x256xf32> to vector<8x256xf32>
    %41 = arith.addf %38, %40 : vector<8x256xf32>
    %cst_33 = arith.constant 0.000000e+00 : f32
    %42 = vector.broadcast %cst_33 : f32 to vector<8x256xf32>
    %43 = arith.cmpf ogt, %41, %42 : vector<8x256xf32>
    %cst_34 = arith.constant 2.000000e-01 : f32
    %44 = vector.broadcast %cst_34 : f32 to vector<8x256xf32>
    %45 = arith.mulf %44, %41 : vector<8x256xf32>
    %46 = arith.select %43, %41, %45 : vector<8x256xi1>, vector<8x256xf32>
    %c0_35 = arith.constant 0 : index
    %c0_36 = arith.constant 0 : index
    %47 = vector.load %arg12[%c0_35, %c0_36] : memref<256x32xf32, #tpu.memory_space<vmem>>, vector<256x32xf32>
    %cst_37 = arith.constant dense<0.000000e+00> : vector<8x32xf32>
    %48 = tpu.matmul %46, %47, %cst_37 {dimension_numbers = #tpu.dot_dimension_numbers<[1], [0], [0], [1], [0, 0, 1, 1], [], []>} : vector<8x256xf32>, vector<256x32xf32>, vector<8x32xf32> -> vector<8x32xf32>
    %c0_38 = arith.constant 0 : index
    %c0_39 = arith.constant 0 : index
    %49 = vector.load %arg13[%c0_38, %c0_39] : memref<1x32xf32, #tpu.memory_space<vmem>>, vector<1x32xf32>
    %50 = vector.broadcast %49 : vector<1x32xf32> to vector<8x32xf32>
    %51 = arith.addf %48, %50 : vector<8x32xf32>
    %c0_40 = arith.constant 0 : index
    %c0_41 = arith.constant 0 : index
    %52 = vector.load %arg15[%c0_40, %c0_41] : memref<8x32xf32, #tpu.memory_space<vmem>>, vector<8x32xf32>
    tpu.vector_store %arg15[%c0_40, %c0_41], %51 {strides = array<i32>} : memref<8x32xf32, #tpu.memory_space<vmem>>, vector<8x32xf32>,
    return
  }
  func.func @transform_0(%arg0: i32) -> (i32, i32) {
    %c0_i32 = arith.constant 0 : i32
    %c0_i32_0 = arith.constant 0 : i32
    return %arg0, %c0_i32 : i32, i32
  }
  func.func @transform_1(%arg0: i32) -> (i32, i32) {
    %c0_i32 = arith.constant 0 : i32
    %c0_i32_0 = arith.constant 0 : i32
    %c0_i32_1 = arith.constant 0 : i32
    return %c0_i32, %c0_i32_0 : i32, i32
  }
  func.func @transform_2(%arg0: i32) -> (i32, i32) {
    %c0_i32 = arith.constant 0 : i32
    %c0_i32_0 = arith.constant 0 : i32
    %c0_i32_1 = arith.constant 0 : i32
    return %c0_i32, %c0_i32_0 : i32, i32
  }
  func.func @transform_3(%arg0: i32) -> (i32, i32) {
    %c0_i32 = arith.constant 0 : i32
    %c0_i32_0 = arith.constant 0 : i32
    %c0_i32_1 = arith.constant 0 : i32
    return %c0_i32, %c0_i32_0 : i32, i32
  }
  func.func @transform_4(%arg0: i32) -> (i32, i32) {
    %c0_i32 = arith.constant 0 : i32
    %c0_i32_0 = arith.constant 0 : i32
    %c0_i32_1 = arith.constant 0 : i32
    return %c0_i32, %c0_i32_0 : i32, i32
  }
  func.func @transform_5(%arg0: i32) -> (i32, i32) {
    %c0_i32 = arith.constant 0 : i32
    %c0_i32_0 = arith.constant 0 : i32
    %c0_i32_1 = arith.constant 0 : i32
    return %c0_i32, %c0_i32_0 : i32, i32
  }
  func.func @transform_6(%arg0: i32) -> (i32, i32) {
    %c0_i32 = arith.constant 0 : i32
    %c0_i32_0 = arith.constant 0 : i32
    %c0_i32_1 = arith.constant 0 : i32
    return %c0_i32, %c0_i32_0 : i32, i32
  }
  func.func @transform_7(%arg0: i32) -> (i32, i32) {
    %c0_i32 = arith.constant 0 : i32
    %c0_i32_0 = arith.constant 0 : i32
    %c0_i32_1 = arith.constant 0 : i32
    return %c0_i32, %c0_i32_0 : i32, i32
  }
  func.func @transform_8(%arg0: i32) -> (i32, i32) {
    %c0_i32 = arith.constant 0 : i32
    %c0_i32_0 = arith.constant 0 : i32
    %c0_i32_1 = arith.constant 0 : i32
    return %c0_i32, %c0_i32_0 : i32, i32
  }
  func.func @transform_9(%arg0: i32) -> (i32, i32) {
    %c0_i32 = arith.constant 0 : i32
    %c0_i32_0 = arith.constant 0 : i32
    %c0_i32_1 = arith.constant 0 : i32
    return %c0_i32, %c0_i32_0 : i32, i32
  }
  func.func @transform_10(%arg0: i32) -> (i32, i32) {
    %c0_i32 = arith.constant 0 : i32
    %c0_i32_0 = arith.constant 0 : i32
    %c0_i32_1 = arith.constant 0 : i32
    return %c0_i32, %c0_i32_0 : i32, i32
  }
  func.func @transform_11(%arg0: i32) -> (i32, i32) {
    %c0_i32 = arith.constant 0 : i32
    %c0_i32_0 = arith.constant 0 : i32
    %c0_i32_1 = arith.constant 0 : i32
    return %c0_i32, %c0_i32_0 : i32, i32
  }
  func.func @transform_12(%arg0: i32) -> (i32, i32) {
    %c0_i32 = arith.constant 0 : i32
    %c0_i32_0 = arith.constant 0 : i32
    %c0_i32_1 = arith.constant 0 : i32
    return %c0_i32, %c0_i32_0 : i32, i32
  }
  func.func @transform_13(%arg0: i32) -> (i32, i32) {
    %c0_i32 = arith.constant 0 : i32
    %c0_i32_0 = arith.constant 0 : i32
    return %arg0, %c0_i32 : i32, i32
  }
  func.func @transform_14(%arg0: i32) -> (i32, i32) {
    %c0_i32 = arith.constant 0 : i32
    %c0_i32_0 = arith.constant 0 : i32
    return %arg0, %c0_i32 : i32, i32
  }
}

</mosaic_0001>

<bundles_post_ra>
// kernel: tpu_custom_call.1
= control target key start
LH: loop header
LB: loop body
LE: loop exit
PB: predicated region body
PF: predicated region fallthrough
CT: control target
= control target key end

     0   :  { %20 = vsyncpa [#allocation3], 0  ;;  %vm63_vm0 = vcmask 261120   ;;  %s910_s0 = inlined_call_operand.vmem [shape: f32[8,32], index: 0, kind: input, shape index: {}]   ;;  %s911_s1 = inlined_call_operand.vmem [shape: f32[32,256], index: 1, kind: input, shape index: {}]   ;;  %s912_s2 = inlined_call_operand.vmem [shape: f32[1,256], index: 2, kind: input, shape index: {}]   ;;  %s913_s3 = inlined_call_operand.vmem [shape: f32[256,64], index: 3, kind: input, shape index: {}]   ;;  %s914_s4 = inlined_call_operand.vmem [shape: f32[1,64], index: 4, kind: input, shape index: {}]   ;;  %s915_s5 = inlined_call_operand.vmem [shape: f32[64,16], index: 5, kind: input, shape index: {}]   ;;  %s916_s6 = inlined_call_operand.vmem [shape: f32[1,16], index: 6, kind: input, shape index: {}]   ;;  %s917_s7 = inlined_call_operand.vmem [shape: f32[16,64], index: 7, kind: input, shape index: {}]   ;;  %s918_s8 = inlined_call_operand.vmem [shape: f32[1,64], index: 8, kind: input, shape index: {}]   ;;  %s919_s9 = inlined_call_operand.vmem [shape: f32[64,256], index: 9, kind: input, shape index: {}]   ;;  %s920_s10 = inlined_call_operand.vmem [shape: f32[1,256], index: 10, kind: input, shape index: {}]   ;;  %s921_s11 = inlined_call_operand.vmem [shape: f32[256,32], index: 11, kind: input, shape index: {}]   ;;  %s922_s12 = inlined_call_operand.vmem [shape: f32[1,32], index: 12, kind: input, shape index: {}]   ;;  %s923_s13 = inlined_call_operand.hbm [shape: f32[8,16], index: 13, kind: output, shape index: {0}]   ;;  %s924_s14 = inlined_call_operand.hbm [shape: f32[8,32], index: 14, kind: output, shape index: {1}]  }
   0x1   :  { %v55_v0 = vld [vmem:[%s911_s1 + $0x30] sm:$0xff]  ;;  %v56_v1 = vld [vmem:[%s911_s1 + $0x38] sm:$0xff]  ;;  %v53_v2 = vld [vmem:[%s911_s1 + $0x20] sm:$0xff] }
   0x2   :  { %79 = vmatpush.msra.mxu0 %v55_v0  ;;  %99 = vmatpush.msra.mxu1 %v56_v1  ;;  %v54_v3 = vld [vmem:[%s911_s1 + $0x28] sm:$0xff]  ;;  %v51_v4 = vld [vmem:[%s911_s1 + $0x10] sm:$0xff]  ;;  %v52_v5 = vld [vmem:[%s911_s1 + $0x18] sm:$0xff] }
   0x3   :  { %v128_v6 = vld [vmem:[%s913_s3 + $0x78] sm:$0xff]  ;;  %v127_v8 = vld [vmem:[%s913_s3 + $0x70] sm:$0xff]  ;;  %v49_v9 = vld [vmem:[%s911_s1] sm:$0xff] }
   0x4   :  { %80 = vmatpush.msra.mxu0 %v53_v2  ;;  %100 = vmatpush.msra.mxu1 %v54_v3  ;;  %v144_v7 = vld [vmem:[%s913_s3 + $0xf8] sm:$0xff]  ;;  %v50_v10 = vld [vmem:[%s911_s1 + $0x8] sm:$0xff]  ;;  %v143_v11 = vld [vmem:[%s913_s3 + $0xf0] sm:$0xff] }
   0x5   :  { %149 = vmatpush.msra.mxu2 %v128_v6  ;;  %169 = vmatpush.msra.mxu3 %v144_v7  ;;  %v48_v12 = vld [vmem:[%s910_s0] sm:$0xff]  ;;  %v126_v13 = vld [vmem:[%s913_s3 + $0x68] sm:$0xff]  ;;  %v124_v17 = vld [vmem:[%s913_s3 + $0x58] sm:$0xff] }
   0x6   :  { %81 = vmatpush.msra.mxu0 %v51_v4  ;;  %101 = vmatpush.msra.mxu1 %v52_v5  ;;  %v142_v14 = vld [vmem:[%s913_s3 + $0xe8] sm:$0xff]  ;;  %v125_v15 = vld [vmem:[%s913_s3 + $0x60] sm:$0xff]  ;;  %v140_v18 = vld [vmem:[%s913_s3 + $0xd8] sm:$0xff] }
   0x7   :  { %150 = vmatpush.msra.mxu2 %v127_v8  ;;  %170 = vmatpush.msra.mxu3 %v143_v11  ;;  %v141_v16 = vld [vmem:[%s913_s3 + $0xe0] sm:$0xff]  ;;  %v123_v19 = vld [vmem:[%s913_s3 + $0x50] sm:$0xff] }
   0x8   :  { %82 = vmatpush.msra.mxu0 %v49_v9  ;;  %102 = vmatpush.msra.mxu1 %v50_v10  ;;  %v139_v20 = vld [vmem:[%s913_s3 + $0xd0] sm:$0xff] }
   0x9   :  { %442 = vmatmul.msk.f32.vlgmr.msra.gmra.mxu0 %vm63_vm0, %v48_v12  ;;  %443 = vmatmul.msk.f32.vlgmr.msra.gmra.mxu1 %vm63_vm0, %v48_v12 }
   0xa   :  { %151 = vmatpush.msra.mxu2 %v126_v13  ;;  %171 = vmatpush.msra.mxu3 %v142_v14 }
   0xc   :  { %152 = vmatpush.msra.mxu2 %v125_v15  ;;  %172 = vmatpush.msra.mxu3 %v141_v16 }
   0xe   :  { %153 = vmatpush.msra.mxu2 %v124_v17  ;;  %173 = vmatpush.msra.mxu3 %v140_v18 }
   0xf   :  { %21 = vsyncpa [#allocation5], 0  ;;  %v122_v21 = vld [vmem:[%s913_s3 + $0x48] sm:$0xff]  ;;  %v121_v23 = vld [vmem:[%s913_s3 + $0x40] sm:$0xff]  ;;  %vm204_vm4 = vcmask 523264   ;;  %vm228_vm5 = vcmask 130048  }
  0x10   :  { %v138_v22 = vld [vmem:[%s913_s3 + $0xc8] sm:$0xff]  ;;  %154 = vmatpush.msra.mxu2 %v123_v19  ;;  %174 = vmatpush.msra.mxu3 %v139_v20  ;;  %v137_v24 = vld [vmem:[%s913_s3 + $0xc0] sm:$0xff]  ;;  %v120_v25 = vld [vmem:[%s913_s3 + $0x38] sm:$0xff]  ;;  %s507_s30 = smov [#allocation4]  }
  0x11   :  { %v136_v26 = vld [vmem:[%s913_s3 + $0xb8] sm:$0xff]  ;;  %v119_v27 = vld [vmem:[%s913_s3 + $0x30] sm:$0xff]  ;;  %v118_v29 = vld [vmem:[%s913_s3 + $0x28] sm:$0xff]  ;;  %s426_s15 = sshll.u32 %s507_s30, 4  ;;  %s427_s15 = int_to_ptr.vmem [resolvable:$true] %s426_s15 }
  0x12   :  { %155 = vmatpush.msra.mxu2 %v122_v21  ;;  %175 = vmatpush.msra.mxu3 %v138_v22  ;;  %v135_v28 = vld [vmem:[%s913_s3 + $0xb0] sm:$0xff]  ;;  %v134_v30 = vld [vmem:[%s913_s3 + $0xa8] sm:$0xff]  ;;  %v117_v31 = vld [vmem:[%s913_s3 + $0x20] sm:$0xff] }
  0x13   :  { %v133_v32 = vld [vmem:[%s913_s3 + $0xa0] sm:$0xff]  ;;  %v116_v33 = vld [vmem:[%s913_s3 + $0x18] sm:$0xff]  ;;  %v115_v35 = vld [vmem:[%s913_s3 + $0x10] sm:$0xff] }
  0x14   :  { %156 = vmatpush.msra.mxu2 %v121_v23  ;;  %176 = vmatpush.msra.mxu3 %v137_v24  ;;  %v132_v34 = vld [vmem:[%s913_s3 + $0x98] sm:$0xff]  ;;  %v131_v36 = vld [vmem:[%s913_s3 + $0x90] sm:$0xff]  ;;  %v114_v37 = vld [vmem:[%s913_s3 + $0x8] sm:$0xff] }
  0x15   :  { %v130_v38 = vld [vmem:[%s913_s3 + $0x88] sm:$0xff]  ;;  %v113_v39 = vld [vmem:[%s913_s3] sm:$0xff]  ;;  %v199_v41 = vld [vmem:[%s915_s5 + $0x38] sm:$0xff] }
  0x16   :  { %157 = vmatpush.msra.mxu2 %v120_v25  ;;  %177 = vmatpush.msra.mxu3 %v136_v26  ;;  %v129_v40 = vld [vmem:[%s913_s3 + $0x80] sm:$0xff]  ;;  %v198_v42 = vld [vmem:[%s915_s5 + $0x30] sm:$0xff]  ;;  %v197_v43 = vld [vmem:[%s915_s5 + $0x28] sm:$0xff] }
  0x17   :  { %216 = vmatpush.msrb.mxu0 %v199_v41  ;;  %v196_v44 = vld [vmem:[%s915_s5 + $0x20] sm:$0xff]  ;;  %v195_v56 = vld [vmem:[%s915_s5 + $0x18] sm:$0xff]  ;;  %v194_v57 = vld [vmem:[%s915_s5 + $0x10] sm:$0xff] }
  0x18   :  { %158 = vmatpush.msra.mxu2 %v119_v27  ;;  %178 = vmatpush.msra.mxu3 %v135_v28  ;;  %v57_v45 = vld [vmem:[%s912_s2] sm:$0x3]  ;;  %v193_v58 = vld [vmem:[%s915_s5 + $0x8] sm:$0xff]  ;;  %v276_v5 = vld [vmem:[%s919_s9 + $0x70] sm:$0xff]  ;;  %s428_s2 = sshll.u32 %s924_s14, 4  ;;  %s429_s2 = int_to_ptr.hbm [resolvable:$true] %s428_s2 }
  0x19   :  { %217 = vmatpush.msrb.mxu0 %v198_v42  ;;  %v59_v46 = vperm.slane %v57_v45, 0  ;;  %v60_v47 = vperm.slane %v57_v45, 1  ;;  %v192_v59 = vld [vmem:[%s915_s5] sm:$0xff]  ;;  %v231_v60 = vld [vmem:[%s917_s7 + $0x8] sm:$0xff]  ;;  %v277_v6 = vld [vmem:[%s919_s9 + $0x78] sm:$0xff] }
  0x1a   :  { %159 = vmatpush.msra.mxu2 %v118_v29  ;;  %179 = vmatpush.msra.mxu3 %v134_v30  ;;  %v230_v61 = vld [vmem:[%s917_s7] sm:$0xff]  ;;  %v275_v8 = vld [vmem:[%s919_s9 + $0x68] sm:$0xff]  ;;  %v272_v9 = vld [vmem:[%s919_s9 + $0x50] sm:$0xff] }
  0x1b   :  { %218 = vmatpush.msrb.mxu0 %v197_v43  ;;  %253 = vmatpush.msrb.mxu1 %v231_v60  ;;  %v450_v62 = vld [vmem:[%s914_s4] ss:$0 sm:$0xff]  ;;  %v273_v10 = vld [vmem:[%s919_s9 + $0x58] sm:$0xff]  ;;  %v271_v12 = vld [vmem:[%s919_s9 + $0x48] sm:$0xff] }
  0x1c   :  { %160 = vmatpush.msra.mxu2 %v117_v31  ;;  %180 = vmatpush.msra.mxu3 %v133_v32  ;;  %v274_v7 = vld [vmem:[%s919_s9 + $0x60] sm:$0xff]  ;;  %v268_v13 = vld [vmem:[%s919_s9 + $0x30] sm:$0xff]  ;;  %v269_v14 = vld [vmem:[%s919_s9 + $0x38] sm:$0xff] }
  0x1d   :  { %219 = vmatpush.msrb.mxu0 %v196_v44  ;;  %254 = vmatpush.msrb.mxu1 %v230_v61  ;;  %v270_v11 = vld [vmem:[%s919_s9 + $0x40] sm:$0xff]  ;;  %v267_v19 = vld [vmem:[%s919_s9 + $0x28] sm:$0xff]  ;;  %v264_v20 = vld [vmem:[%s919_s9 + $0x10] sm:$0xff] }
  0x1e   :  { %161 = vmatpush.msra.mxu2 %v116_v33  ;;  %181 = vmatpush.msra.mxu3 %v132_v34  ;;  %v451_v15 = vld [vmem:[%s916_s6] ss:$0 sm:$0xff]  ;;  %v265_v21 = vld [vmem:[%s919_s9 + $0x18] sm:$0xff]  ;;  %v263_v23 = vld [vmem:[%s919_s9 + $0x8] sm:$0xff] }
  0x1f   :  { %220 = vmatpush.msrb.mxu0 %v195_v56  ;;  %v266_v18 = vld [vmem:[%s919_s9 + $0x20] sm:$0xff]  ;;  %v364_v24 = vld [vmem:[%s921_s11 + $0xf8] sm:$0xff]  ;;  %v363_v25 = vld [vmem:[%s921_s11 + $0xf0] sm:$0xff] }
  0x20   :  { %162 = vmatpush.msra.mxu2 %v115_v35  ;;  %182 = vmatpush.msra.mxu3 %v131_v36  ;;  %v262_v22 = vld [vmem:[%s919_s9] sm:$0xff]  ;;  %v348_v26 = vld [vmem:[%s921_s11 + $0x78] sm:$0xff]  ;;  %v347_v27 = vld [vmem:[%s921_s11 + $0x70] sm:$0xff] }
  0x21   :  { %221 = vmatpush.msrb.mxu0 %v194_v57  ;;  %v362_v28 = vld [vmem:[%s921_s11 + $0xe8] sm:$0xff]  ;;  %369 = vmatpush.msra.mxu1 %v348_v26  ;;  %v361_v30 = vld [vmem:[%s921_s11 + $0xe0] sm:$0xff]  ;;  %v360_v32 = vld [vmem:[%s921_s11 + $0xd8] sm:$0xff] }
  0x22   :  { %163 = vmatpush.msra.mxu2 %v114_v37  ;;  %183 = vmatpush.msra.mxu3 %v130_v38  ;;  %v346_v29 = vld [vmem:[%s921_s11 + $0x68] sm:$0xff]  ;;  %v345_v31 = vld [vmem:[%s921_s11 + $0x60] sm:$0xff]  ;;  %v344_v33 = vld [vmem:[%s921_s11 + $0x58] sm:$0xff] }
  0x23   :  { %222 = vmatpush.msrb.mxu0 %v193_v58  ;;  %370 = vmatpush.msra.mxu1 %v347_v27  ;;  %v359_v34 = vld [vmem:[%s921_s11 + $0xd0] sm:$0xff]  ;;  %v358_v36 = vld [vmem:[%s921_s11 + $0xc8] sm:$0xff]  ;;  %v357_v38 = vld [vmem:[%s921_s11 + $0xc0] sm:$0xff] }
  0x24   :  { %164 = vmatpush.msra.mxu2 %v113_v39  ;;  %184 = vmatpush.msra.mxu3 %v129_v40  ;;  %v343_v35 = vld [vmem:[%s921_s11 + $0x50] sm:$0xff]  ;;  %v342_v37 = vld [vmem:[%s921_s11 + $0x48] sm:$0xff]  ;;  %v341_v39 = vld [vmem:[%s921_s11 + $0x40] sm:$0xff] }
  0x25   :  { %223 = vmatpush.msrb.mxu0 %v192_v59  ;;  %371 = vmatpush.msra.mxu1 %v346_v29  ;;  %v356_v40 = vld [vmem:[%s921_s11 + $0xb8] sm:$0xff]  ;;  %v355_v42 = vld [vmem:[%s921_s11 + $0xb0] sm:$0xff]  ;;  %v354_v44 = vld [vmem:[%s921_s11 + $0xa8] sm:$0xff] }
  0x26   :  { %295 = vmatpush.msrb.mxu3 %v276_v5  ;;  %389 = vmatpush.msrb.mxu2 %v364_v24  ;;  %v340_v41 = vld [vmem:[%s921_s11 + $0x38] sm:$0xff]  ;;  %v339_v43 = vld [vmem:[%s921_s11 + $0x30] sm:$0xff]  ;;  %v353_v45 = vld [vmem:[%s921_s11 + $0xa0] sm:$0xff] }
  0x27   :  { %315 = vmatpush.msra.mxu0 %v277_v6  ;;  %372 = vmatpush.msra.mxu1 %v345_v31  ;;  %v336_v56 = vld [vmem:[%s921_s11 + $0x18] sm:$0xff]  ;;  %v349_v57 = vld [vmem:[%s921_s11 + $0x80] sm:$0xff]  ;;  %v335_v58 = vld [vmem:[%s921_s11 + $0x10] sm:$0xff] }
  0x28   :  { %296 = vmatpush.msrb.mxu3 %v274_v7  ;;  %390 = vmatpush.msrb.mxu2 %v363_v25  ;;  %v334_v59 = vld [vmem:[%s921_s11 + $0x8] sm:$0xff]  ;;  %v333_v60 = vld [vmem:[%s921_s11] sm:$0xff] }
  0x29   :  { %316 = vmatpush.msra.mxu0 %v275_v8  ;;  %373 = vmatpush.msra.mxu1 %v344_v33  ;;  %v278_v61 = vld [vmem:[%s920_s10] sm:$0x3]  ;;  %s417_s10 = sshll.u32 %s923_s13, 4  ;;  %s418_s10 = int_to_ptr.hbm [resolvable:$true] %s417_s10 }
  0x2a   :  { %297 = vmatpush.msrb.mxu3 %v272_v9  ;;  %391 = vmatpush.msrb.mxu2 %v362_v28  ;;  %v453_v8 = vld [vmem:[%s922_s12] ss:$0 sm:$0xff] }
  0x2b   :  { %317 = vmatpush.msra.mxu0 %v273_v10  ;;  %374 = vmatpush.msra.mxu1 %v343_v35 }
  0x2c   :  { %298 = vmatpush.msrb.mxu3 %v270_v11  ;;  %392 = vmatpush.msrb.mxu2 %v361_v30 }
  0x2d   :  { %318 = vmatpush.msra.mxu0 %v271_v12  ;;  %375 = vmatpush.msra.mxu1 %v342_v37 }
  0x2e   :  { %299 = vmatpush.msrb.mxu3 %v268_v13  ;;  %393 = vmatpush.msrb.mxu2 %v360_v32 }
  0x2f   :  { %319 = vmatpush.msra.mxu0 %v269_v14  ;;  %376 = vmatpush.msra.mxu1 %v341_v39 }
  0x30   :  { %300 = vmatpush.msrb.mxu3 %v266_v18  ;;  %394 = vmatpush.msrb.mxu2 %v359_v34 }
  0x31   :  { %320 = vmatpush.msra.mxu0 %v267_v19  ;;  %377 = vmatpush.msra.mxu1 %v340_v41 }
  0x32   :  { %301 = vmatpush.msrb.mxu3 %v264_v20  ;;  %395 = vmatpush.msrb.mxu2 %v358_v36 }
  0x33   :  { %321 = vmatpush.msra.mxu0 %v265_v21  ;;  %378 = vmatpush.msra.mxu1 %v339_v43 }
  0x34   :  { %302 = vmatpush.msrb.mxu3 %v262_v22  ;;  %396 = vmatpush.msrb.mxu2 %v357_v38 }
  0x35   :  { %322 = vmatpush.msra.mxu0 %v263_v23 }
  0x36   :  { %397 = vmatpush.msrb.mxu2 %v356_v40 }
  0x38   :  { %398 = vmatpush.msrb.mxu2 %v355_v42 }
  0x3a   :  { %399 = vmatpush.msrb.mxu2 %v354_v44 }
  0x3c   :  { %400 = vmatpush.msrb.mxu2 %v353_v45 }
  0x86   :  { %v84_v48 = vpop.f32.mrf.mxu0  ;;  %v104_v49 = vpop.f32.mrf.mxu1 }
  0x87   :  { %v85_v50 = vadd.f32 %v84_v48, %v59_v46  ;;  %v105_v51 = vadd.f32 %v104_v49, %v60_v47  ;;  %v352_v46 = vld [vmem:[%s921_s11 + $0x98] sm:$0xff]  ;;  %v452_v47 = vld [vmem:[%s918_s8] ss:$0 sm:$0xff] }
  0x88   :  { %401 = vmatpush.msrb.mxu2 %v352_v46 }
  0x89   :  { %vm107_vm1 = vcmp.gt.f32.partialorder %v85_v50, 0.0  ;;  %v109_v52 = vmul.f32 0.2, %v85_v50  ;;  %vm108_vm2 = vcmp.gt.f32.partialorder %v105_v51, 0.0  ;;  %v110_v53 = vmul.f32 0.2, %v105_v51 }
  0x8b   :  { %v111_v54 = vsel %vm107_vm1, %v85_v50, %v109_v52  ;;  %v112_v55 = vsel %vm108_vm2, %v105_v51, %v110_v53  ;;  %v338_v52 = vld [vmem:[%s921_s11 + $0x28] sm:$0xff]  ;;  %v351_v53 = vld [vmem:[%s921_s11 + $0x90] sm:$0xff] }
  0x8c   :  { %165 = vmatmul.f32.vlgmr.msra.gmra.mxu2 %v111_v54  ;;  %185 = vmatmul.f32.vlgmr.msra.gmra.mxu3 %v112_v55  ;;  %v337_v54 = vld [vmem:[%s921_s11 + $0x20] sm:$0xff]  ;;  %v350_v55 = vld [vmem:[%s921_s11 + $0x88] sm:$0xff]  ;;  %s506_s11 = smov [#allocation2]  }
  0x8d   :  { %379 = vmatpush.msra.mxu1 %v338_v52  ;;  %402 = vmatpush.msrb.mxu2 %v351_v53  ;;  %s415_s28 = sshll.u32 %s506_s11, 4  ;;  %s416_s28 = int_to_ptr.vmem [resolvable:$true] %s415_s28 }
  0x8f   :  { %380 = vmatpush.msra.mxu1 %v337_v54  ;;  %403 = vmatpush.msrb.mxu2 %v350_v55 }
  0x91   :  { %381 = vmatpush.msra.mxu1 %v336_v56  ;;  %404 = vmatpush.msrb.mxu2 %v349_v57 }
  0x93   :  { %382 = vmatpush.msra.mxu1 %v335_v58 }
  0x95   :  { %383 = vmatpush.msra.mxu1 %v334_v59 }
  0x97   :  { %384 = vmatpush.msra.mxu1 %v333_v60 }
 0x10f   :  { %v166_v63 = vpop.f32.mrf.mxu2  ;;  %v186_v1 = vpop.f32.mrf.mxu3 }
 0x110   :  { %v167_v0 = vadd.f32 %v450_v62, %v166_v63  ;;  %v281_v62 = vperm.slane %v278_v61, 1 }
 0x112   :  { %v187_v2 = vadd.f32 %v186_v1, %v167_v0 }
 0x114   :  { %vm189_vm3 = vcmp.gt.f32.partialorder %v187_v2, 0.0  ;;  %v190_v3 = vmul.f32 0.2, %v187_v2 }
 0x116   :  { %v191_v4 = vsel %vm189_vm3, %v187_v2, %v190_v3  ;;  %v280_v2 = vperm.slane %v278_v61, 0 }
 0x117   :  { %444 = vmatmul.msk.f32.vlgmr.msrb.gmra.mxu0 %vm204_vm4, %v191_v4 }
 0x194   :  { %v225_v16 = vpop.f32.mrf.mxu0 }
 0x195   :  { %v226_v17 = vadd.f32 %v451_v15, %v225_v16 }
 0x197   :  { %445 = vmatmul.msk.f32.vlgmr.msrb.gmra.mxu1 %vm228_vm5, %v226_v17  ;;  %229 = vst.msk [vmem:[#allocation2] sm:$0xff] %vm228_vm5, %v226_v17 }
 0x198   :  { %420 = dma.vmem_to_hbm [thread:$0]  %s416_s28, 128, %s418_s10, [#allocation3]  }
 0x214   :  { %v256_v48 = vpop.f32.mrf.mxu1 }
 0x215   :  { %v257_v49 = vadd.f32 %v452_v47, %v256_v48 }
 0x217   :  { %vm259_vm6 = vcmp.gt.f32.partialorder %v257_v49, 0.0  ;;  %v260_v50 = vmul.f32 0.2, %v257_v49 }
 0x219   :  { %v261_v51 = vsel %vm259_vm6, %v257_v49, %v260_v50 }
 0x21a   :  { %446 = vmatmul.msk.f32.vlgmr.msrb.gmra.mxu3 %vm204_vm4, %v261_v51  ;;  %447 = vmatmul.msk.f32.vlgmr.msra.gmra.mxu0 %vm204_vm4, %v261_v51 }
 0x297   :  { %v324_v63 = vpop.f32.mrf.mxu0 }
 0x298   :  { %v325_v0 = vadd.f32 %v324_v63, %v281_v62 }
 0x29a   :  { %v330_v1 = vmul.f32 0.2, %v325_v0  ;;  %vm328_vm7 = vcmp.gt.f32.partialorder %v325_v0, 0.0 }
 0x29c   :  { %v332_v3 = vsel %vm328_vm7, %v325_v0, %v330_v1 }
 0x29d   :  { %v304_v4 = vpop.f32.mrf.mxu3  ;;  %405 = vmatmul.f32.vlgmr.msrb.gmra.mxu2 %v332_v3 }
 0x29e   :  { %v305_v5 = vadd.f32 %v304_v4, %v280_v2 }
 0x2a0   :  { %vm327_vm8 = vcmp.gt.f32.partialorder %v305_v5, 0.0  ;;  %v329_v6 = vmul.f32 0.2, %v305_v5 }
 0x2a2   :  { %v331_v7 = vsel %vm327_vm8, %v305_v5, %v329_v6 }
 0x2a3   :  { %385 = vmatmul.f32.vlgmr.msra.gmra.mxu1 %v331_v7 }
 0x320   :  { %v386_v9 = vpop.f32.mrf.mxu1  ;;  %v406_v11 = vpop.f32.mrf.mxu2 }
 0x321   :  { %v387_v10 = vadd.f32 %v453_v8, %v386_v9 }
 0x323   :  { %v407_v12 = vadd.f32 %v406_v11, %v387_v10 }
 0x325   :  { %409 = vst.msk [vmem:[#allocation4] sm:$0xff] %vm63_vm0, %v407_v12 }
 0x326   :  { %431 = dma.vmem_to_hbm [thread:$0]  %s427_s15, 128, %s429_s2, [#allocation5]  }
 0x327   :  { %502 = dma.done.wait [#allocation3], 128  }
 0x328   :  { %503 = vsyncadd [#allocation3], 4294967168 }
 0x329   :  { %504 = dma.done.wait [#allocation5], 128  }
 0x32a   :  { %505 = vsyncadd [#allocation5], 4294967168 }
 0x32b   :  { %440 = vsyncpa [#allocation3], 1 }
 0x32c   :  { %441 = vsyncpa [#allocation5], 1 }

</bundles_post_ra>
